<compile_context>
chip_gen: v7x
topology: tpu7x:2x2x1
jax: 0.10.0
libtpu: 0.0.40
codegen_flags: <defaults>
</compile_context>

<pallas_src>
import functools

import jax
import jax.numpy as jnp
from jax import lax
from jax.experimental import pallas as pl
from jax.experimental.pallas import tpu as pltpu

# The PyTorch file references SPECIAL_TOKENS_2_INDEX from elsewhere; define a
# standard set here (only the '<pad>' index matters for this module).
SPECIAL_TOKENS = ["<pad>", "<unk>", "<bos>", "<eos>"]
SPECIAL_TOKENS_2_INDEX = {t: i for i, t in enumerate(SPECIAL_TOKENS)}
PAD_IDX = SPECIAL_TOKENS_2_INDEX["<pad>"]


def _round_up(x, m):
    return ((x + m - 1) // m) * m


# ----------------------------------------------------------------------------- #
# Pallas kernel: HBM row-gather via windowed async DMAs
# ----------------------------------------------------------------------------- #
def embedding_gather_kernel(ids_ref, w_hbm, out_ref, sem, *, window):
    """DMA-gather embedding rows from HBM into the output block.

    ids_ref: (n_pad,) int32 token ids in SMEM (scalar prefetch).
    w_hbm:   (vocab_dim, embed_dim) f32 embedding table, left in HBM.
    out_ref: (tile, embed_dim) f32 output block in VMEM.
    sem:     single DMA semaphore; up to `window` row copies in flight.
    """
    tile = out_ref.shape[0]
    base = pl.program_id(0) * tile

    def start_row(r):
        tok = ids_ref[base + r]
        pltpu.make_async_copy(
            w_hbm.at[pl.ds(tok, 1), :],
            out_ref.at[pl.ds(r, 1), :],
            sem,
        ).start()

    def wait_one_row():
        # Every row copy moves the same number of bytes and signals `sem`, so
        # waiting with any same-shaped descriptor retires exactly one of them.
        pltpu.make_async_copy(
            w_hbm.at[pl.ds(0, 1), :],
            out_ref.at[pl.ds(0, 1), :],
            sem,
        ).wait()

    def step(i, carry):
        @pl.when(i < tile)
        def _():
            start_row(i)

        @pl.when(i >= window)
        def _():
            wait_one_row()

        return carry

    # Sliding window: issue row i, retire row i - window.  After tile + window
    # steps all `tile` row DMAs have completed, so the block is ready for the
    # pipeline's automatic writeback.
    lax.fori_loop(0, tile + window, step, 0)

    # TODO(synk): for tables known to be tiny (like the toy shapes below), an
    # in-VMEM variant (whole table resident, per-row copies inside VMEM) would
    # avoid the per-row HBM DMA overhead; the HBM-streaming form is kept as the
    # single path because it is the one that scales to realistic vocab sizes.


# ----------------------------------------------------------------------------- #
# Wrapper
# ----------------------------------------------------------------------------- #
def embedding_forward(x, weight, *, tile=1024, window=64):
    """x: (B, S) int32 token ids; weight: (vocab_dim, embed_dim) f32."""
    B, S = x.shape
    vocab_dim, embed_dim = weight.shape
    N = B * S

    # Row tile: large to amortize per-grid-step overhead, multiple of 8
    # (f32 sublane), never larger than the padded token count.
    tile = max(8, min(tile, _round_up(N, 8)))
    tile = (tile // 8) * 8
    n_pad = _round_up(N, tile)

    ids = x.reshape(N).astype(jnp.int32)
    if n_pad != N:
        ids = jnp.pad(ids, (0, n_pad - N), constant_values=PAD_IDX)

    grid = (n_pad // tile,)

    out = pl.pallas_call(
        functools.partial(embedding_gather_kernel, window=window),
        out_shape=jax.ShapeDtypeStruct((n_pad, embed_dim), weight.dtype),
        grid_spec=pltpu.PrefetchScalarGridSpec(
            num_scalar_prefetch=1,          # token ids -> SMEM
            grid=grid,
            in_specs=[
                # Embedding table stays in HBM; rows are DMA-gathered on demand.
                pl.BlockSpec(memory_space=pl.ANY),
            ],
            out_specs=pl.BlockSpec((tile, embed_dim), lambda i, ids: (i, 0)),
            scratch_shapes=[pltpu.SemaphoreType.DMA(())],
        ),
        compiler_params=pltpu.CompilerParams(
            # Independent row tiles; even grid so both v7x cores get work.
            dimension_semantics=("parallel",),
        ),
    )(ids, weight)

    return out[:N].reshape(B, S, embed_dim)


# ----------------------------------------------------------------------------- #
# Pure-JAX reference (mirrors the PyTorch forward: a plain lookup)
# ----------------------------------------------------------------------------- #
def reference_forward(x, weight):
    return weight[x]


# ----------------------------------------------------------------------------- #
if __name__ == "__main__":
    vocab_dim = 100
    embed_dim = 32
    sparse = False  # TODO(synk): `sparse` only changes the gradient
                    # representation in PyTorch; it has no forward-pass effect.

    key = jax.random.PRNGKey(0)
    k_w, k_x = jax.random.split(key)

    # nn.Embedding default init: N(0, 1); padding_idx row zeroed.
    weight = jax.random.normal(k_w, (vocab_dim, embed_dim), dtype=jnp.float32)
    weight = weight.at[PAD_IDX].set(0.0)

    # 4 x 512 = 2048 tokens -> two 1024-row tiles (even grid for v7x megacore).
    B, S = 4, 512
    x = jax.random.randint(k_x, (B, S), 0, vocab_dim, dtype=jnp.int32)
    x = x.at[0, 0].set(PAD_IDX)                           # include <pad>
    x = x.at[1, 3].set(SPECIAL_TOKENS_2_INDEX["<bos>"])   # include <bos>

    out = embedding_forward(x, weight, tile=1024)
    out = jax.block_until_ready(out)

    ref = reference_forward(x, weight)

    assert out.shape == (B, S, embed_dim)
    # A real gather is bit-exact by construction.
    assert jnp.array_equal(out, ref), "mismatch vs reference"
    assert jnp.all(out[0, 0] == 0.0), "padding row must be zero"

    print("KERNEL_OK")
</pallas_src>

<mosaic_0001>
module attributes {stable_mosaic.version = 11 : i64} {
  func.func @embedding_gather_kernel(%arg0: i32, %arg1: memref<2048xi32, #tpu.memory_space<smem>>, %arg2: memref<100x32xf32, #tpu.memory_space<any>>, %arg3: memref<1024x32xf32, #tpu.memory_space<vmem>>, %arg4: memref<!tpu.dma_semaphore, #tpu.memory_space<semaphore_mem>>) attributes {dimension_semantics = [#tpu.dimension_semantics<parallel>], iteration_bounds = array<i64: 2>, scalar_prefetch = 1 : i64, scratch_operands = 1 : i64, tpu.core_type = #tpu.core_type<tc>, window_params = [{}, {transform_indices = @transform_1, window_bounds = array<i64: 1024, 32>}]} {
    %c1024_i32 = arith.constant 1024 : i32
    %0 = arith.muli %arg0, %c1024_i32 : i32
    %c0_i32 = arith.constant 0 : i32
    %c1088_i32 = arith.constant 1088 : i32
    %1 = arith.addi %c0_i32, %c1088_i32 : i32
    %c1_i32 = arith.constant 1 : i32
    scf.for %arg5 = %c0_i32 to %1 step %c1_i32  : i32 {
      %c1024_i32_1 = arith.constant 1024 : i32
      %2 = arith.cmpi slt, %arg5, %c1024_i32_1 : i32
      %3 = arith.extui %2 : i1 to i32
      %c0_i32_2 = arith.constant 0 : i32
      %4 = arith.cmpi ne, %3, %c0_i32_2 : i32
      scf.if %4 {
        %8 = arith.addi %0, %arg5 : i32
        %9 = arith.index_cast %8 : i32 to index
        %10 = memref.load %arg1[%9] : memref<2048xi32, #tpu.memory_space<smem>>
        %c0_i32_4 = arith.constant 0 : i32
        %11 = tpu.memref_slice %arg2[%10, %c0_i32_4] : memref<100x32xf32, #tpu.memory_space<any>> -> memref<1x32xf32, #tpu.memory_space<any>>
        %c0_i32_5 = arith.constant 0 : i32
        %12 = tpu.memref_slice %arg3[%arg5, %c0_i32_5] : memref<1024x32xf32, #tpu.memory_space<vmem>> -> memref<1x32xf32, #tpu.memory_space<vmem>>
        tpu.enqueue_dma source(%11 : memref<1x32xf32, #tpu.memory_space<any>>) target(%12 : memref<1x32xf32, #tpu.memory_space<vmem>>) target_semaphore(%arg4 : memref<!tpu.dma_semaphore, #tpu.memory_space<semaphore_mem>>)
      } else {
      }
      %c64_i32 = arith.constant 64 : i32
      %5 = arith.cmpi sge, %arg5, %c64_i32 : i32
      %6 = arith.extui %5 : i1 to i32
      %c0_i32_3 = arith.constant 0 : i32
      %7 = arith.cmpi ne, %6, %c0_i32_3 : i32
      scf.if %7 {
        %c0_i32_4 = arith.constant 0 : i32
        %c0_i32_5 = arith.constant 0 : i32
        %8 = tpu.memref_slice %arg2[%c0_i32_4, %c0_i32_5] : memref<100x32xf32, #tpu.memory_space<any>> -> memref<1x32xf32, #tpu.memory_space<any>>
        %c0_i32_6 = arith.constant 0 : i32
        %c0_i32_7 = arith.constant 0 : i32
        %9 = tpu.memref_slice %arg3[%c0_i32_6, %c0_i32_7] : memref<1024x32xf32, #tpu.memory_space<vmem>> -> memref<1x32xf32, #tpu.memory_space<vmem>>
        tpu.wait_dma2 semaphore(%arg4 : memref<!tpu.dma_semaphore, #tpu.memory_space<semaphore_mem>>) src(%8 : memref<1x32xf32, #tpu.memory_space<any>>) dst(%9 : memref<1x32xf32, #tpu.memory_space<vmem>>)
      } else {
      }
    }
    %c1088_i32_0 = arith.constant 1088 : i32
    return
  }
  func.func @transform_1(%arg0: i32, %arg1: memref<2048xi32, #tpu.memory_space<smem>>) -> (i32, i32) {
    %c0_i32 = arith.constant 0 : i32
    %c0_i32_0 = arith.constant 0 : i32
    return %arg0, %c0_i32 : i32, i32
  }
}

</mosaic_0001>

<bundles_post_ra>
// kernel: tpu_custom_call.1
= control target key start
LH: loop header
LB: loop body
LE: loop exit
PB: predicated region body
PF: predicated region fallthrough
CT: control target
= control target key end

     0   :  { %s288_s0 = inlined_call_operand.vmem [shape: s32[2048], index: 0, kind: input, shape index: {}]   ;;  %s289_s1 = inlined_call_operand.vmem [shape: f32[100,32], index: 1, kind: input, shape index: {}]   ;;  %s290_s2 = inlined_call_operand.vmem [shape: f32[2048,32], index: 2, kind: output, shape index: {}]  }
   0x1   :  { %s7_s11 = sshll.u32 %s288_s0, 4  ;;  %s8_s11 = int_to_ptr.vmem [resolvable:$true] %s7_s11 }
   0x2   :  { %s218_s12 = scalar_lea.vmem %s8_s11, 256  ;;  %p223_p1 = scmp.lt.s32.totalorder %s8_s11, %s8_s11 }
   0x3   :  { %p219_p0 = scmp.ne.s32.totalorder %s8_s11, %s218_s12  ;;  %p224_p2 = scmp.lt.s32.totalorder %s218_s12, %s218_s12 }
   0x5   :  { %p225_p3 = por %p224_p2, %p223_p1 }
   0x7   :  { %p226_p4 = pnand %p225_p3, %p219_p0 }
   0x9   :  { %229 = shalt.err (!%p226_p4)  }
   0xa   :  { %s252_s13 = smov [#allocation4]  }
   0xb   :  { %10 = dma.vmem_to_smem %s8_s11, 256, %s252_s13, [#allocation3] }
   0xc   :  { %238 = dma.done.wait [#allocation3], 256 }
   0xd   :  { %239 = vsyncadd [#allocation3], 4294967040 }
   0xe   :  { %12 = sfence }
   0xf   :  { %s271_s14 = smov 0  }
  0x10 LB: > { %p189_p5 = scmp.ge.s32.totalorder %s246_s14, 2  ;;  %s246_s14 = sphi %s271_s14, %s18_s14  }
  0x11   : > { %s190_s0 = sshll.u32 (!%p189_p5), %s246_s14, 7  ;;  %s192_s15 = sshll.u32 (!%p189_p5), %s246_s14, 10 }
  0x12   : > { %43 = sbr.rel (%p189_p5) target bundleno = 53 (0x35), region = 12  ;;  %p52_p6 = scmp.lt.s32.totalorder (!%p189_p5), %s190_s0, 255 }
  0x13   : > { %s248_s20 = smov (!%p189_p5), 0  }
  0x19   : > { %s292_s0 = smov (!%p52_p6, %s190_s0), 255 }
  0x1a   : > { %s191_s16 = sshll.u32 %s292_s0, 3 }
  0x1b   : > { %s55_s19 = scalar_lea.vmem %s290_s2, %s191_s16 }
  0x1c LB: >> { %p193_p7 = scmp.ge.s32.totalorder %s250_s20, 1024  ;;  %s250_s20 = sphi %s248_s20, %s63_s20  }
  0x1d   : >> { %s68_s21 = sadd.s32 (!%p193_p7), %s250_s20, %s192_s15  ;;  %s71_s23 = scalar_lea.vmem (!%p193_p7), %s55_s19, %s250_s20 }
  0x1e   : >> { %67 = sbr.rel (%p193_p7) target bundleno = 40 (0x28), region = 23  ;;  %s69_s22 = sld [smem:[#allocation4 + %s68_s21]] (!%p193_p7) }
  0x24   : >> { %s70_s26 = scalar_lea.vmem (!%p193_p7), %s289_s1, %s69_s22 }
  0x25   : >> { %v89_v0 = vld [vmem:[%s70_s26] sm:$0x1] }
  0x26   : >> { %90 = vst [vmem:[%s71_s23] sm:$0x1] %v89_v0 }
  0x27   : >> { %115 = vsyncadd [#allocation2], 16 }
  0x28 PF: >> { %p200_p8 = scmp.ge.s32.totalorder %s250_s20, 64 }
  0x2a   : >> { %241 = dma.done.wait (%p200_p8), [#allocation2], 16 }
  0x2b   : >> { %243 = vsyncadd (%p200_p8), [#allocation2], 4294967280  ;;  %s63_s20 = sadd.s32 1, %s250_s20  }
  0x2c   : >> { %p60_p9 = scmp.ge.s32.totalorder %s63_s20, 1088  }
  0x2e   : > { %62 = sbr.rel (!%p60_p9) target bundleno = 28 (0x1c), region = 96 }
  0x35 PF: > { %s18_s14 = sadd.s32 1, %s246_s14  }
  0x36   : > { %p15_p10 = scmp.ge.s32.totalorder %s18_s14, 3  }
  0x38   :  { %17 = sbr.rel (!%p15_p10) target bundleno = 16 (0x10), region = 107 }
  0x3f   :  { %145 = vsyncmov [#allocation2] }
  0x42   :  { %s146_s27 = vpop.sfrf %145 }
  0x43   :  { %p197_p11 = scmp.ne.s32.totalorder %s146_s27, 0 }
  0x45   :  { %150 = shalt.err (%p197_p11)  }

</bundles_post_ra>
